<compile_context>
chip_gen: v7x
topology: tpu7x:2x2x1
jax: 0.10.0
libtpu: 0.0.40
codegen_flags: <defaults>
</compile_context>

<pallas_src>
import functools
import math

import jax
import jax.numpy as jnp
from jax.experimental import pallas as pl
from jax.experimental.pallas import tpu as pltpu

_LANE = 128            # TPU vreg lane width
_TILE_B = 32 * 1024    # default batch tile for the gridded path (~0.75 MiB f32 of x;
                       # double-buffered this is still tiny vs v7x's 64 MiB VMEM)


def _linear_sigmoid_kernel(x_ref, w_ref, b_ref, o_ref, *, approx_sigmoid):
    """sigmoid(w . x + b) with OUT == 1, batch-on-lanes layout.

    x_ref: (IN, TB) f32/bf16 in VMEM  -- batch on the lane axis (lane-dense)
    w_ref: (IN, 1)  f32 in VMEM       -- broadcasts across lanes
    b_ref: (1,)     f32 in SMEM       -- scalar bias
    o_ref: (1, TB)  f32 in VMEM       -- unmasked full-width lane stores
    """
    x = x_ref[...]
    if x.dtype != jnp.float32:
        x = x.astype(jnp.float32)            # bf16 input path: cheap in-vreg upcast
    w = w_ref[...]                           # (IN, 1) -> lane broadcast
    b = b_ref[0]                             # scalar from SMEM
    # Deliberately NOT an MXU matmul: VPU broadcast-multiply + sublane reduce
    # over IN=6 (a padded systolic pass would be <0.05% utilized).
    z = jnp.sum(x * w, axis=0, keepdims=True) + b        # (1, TB)
    if approx_sigmoid:
        # Large-B path: keep both exp and reciprocal on the otherwise-idle EUP.
        e = jnp.exp(-z)
        o_ref[...] = pl.reciprocal(1.0 + e, approx=True)
    else:
        o_ref[...] = jax.nn.sigmoid(z)


def _forward(x, weight, bias, *, tile_b=_TILE_B):
    """x: (B, IN); weight: (OUT=1, IN) torch layout; bias: (OUT,) -> (B, 1) f32."""
    B, IN = x.shape
    x_t = x.T                                           # (IN, B): batch on lanes
    w_t = weight.reshape(IN, 1).astype(jnp.float32)     # (IN, 1)
    b1 = bias.reshape(1).astype(jnp.float32)            # (1,) scalar in SMEM

    use_grid = (B >= 2 * _LANE) and (B % _LANE == 0)

    if not use_grid:
        # Tiny-batch path: single ungridded block, everything resident in VMEM.
        out = pl.pallas_call(
            functools.partial(_linear_sigmoid_kernel, approx_sigmoid=False),
            out_shape=jax.ShapeDtypeStruct((1, B), jnp.float32),
            in_specs=[
                pl.BlockSpec(memory_space=pltpu.MemorySpace.VMEM),   # x_t (IN, B)
                pl.BlockSpec(memory_space=pltpu.MemorySpace.VMEM),   # w_t (IN, 1)
                pl.BlockSpec(memory_space=pltpu.MemorySpace.SMEM),   # bias (1,)
            ],
            out_specs=pl.BlockSpec(memory_space=pltpu.MemorySpace.VMEM),
        )(x_t, w_t, b1)
    else:
        # Scaling path: grid over batch with large lane-dense tiles.
        tb = math.gcd(B, max(tile_b, _LANE))             # multiple of 128 dividing B
        grid = (B // tb,)
        out = pl.pallas_call(
            functools.partial(_linear_sigmoid_kernel, approx_sigmoid=True),
            out_shape=jax.ShapeDtypeStruct((1, B), jnp.float32),
            grid_spec=pltpu.PrefetchScalarGridSpec(
                num_scalar_prefetch=0,
                grid=grid,
                in_specs=[
                    pl.BlockSpec((IN, tb), lambda i: (0, i)),        # x tile
                    pl.BlockSpec((IN, 1), lambda i: (0, 0)),         # weight (reused)
                    pl.BlockSpec(memory_space=pltpu.MemorySpace.SMEM),  # bias scalar
                ],
                out_specs=pl.BlockSpec((1, tb), lambda i: (0, i)),
            ),
            compiler_params=pltpu.CompilerParams(
                dimension_semantics=("parallel",),   # v7x: split batch across both TCs
            ),
        )(x_t, w_t, b1)

    return out.T                                         # (B, 1), matches PyTorch


m_classifier_forward = jax.jit(_forward, static_argnames=("tile_b",))


if __name__ == "__main__":
    key = jax.random.PRNGKey(0)
    kx, kw, kb, kx2 = jax.random.split(key, 4)

    B, IN, OUT = 8, 6, 1
    # Deterministic params mimicking nn.Linear default init: U(-1/sqrt(IN), 1/sqrt(IN))
    bound = 1.0 / jnp.sqrt(jnp.float32(IN))
    weight = jax.random.uniform(kw, (OUT, IN), jnp.float32, -bound, bound)  # torch (out, in)
    bias = jax.random.uniform(kb, (OUT,), jnp.float32, -bound, bound)

    # --- small-batch path (ungridded, exact sigmoid) ---
    x = jax.random.normal(kx, (B, IN), jnp.float32)
    out = jax.block_until_ready(m_classifier_forward(x, weight, bias))
    ref = jax.nn.sigmoid(x @ weight.T + bias)
    assert out.shape == (B, OUT)
    assert jnp.allclose(out, ref, atol=1e-5, rtol=1e-5)

    # --- large-batch path (lane-dense, gridded, megacore-parallel, EUP sigmoid) ---
    B2 = 512
    x2 = jax.random.normal(kx2, (B2, IN), jnp.float32)
    out2 = jax.block_until_ready(m_classifier_forward(x2, weight, bias, tile_b=256))
    ref2 = jax.nn.sigmoid(x2 @ weight.T + bias)
    assert out2.shape == (B2, OUT)
    assert jnp.allclose(out2, ref2, atol=2e-2, rtol=0.0)  # approx EUP reciprocal tolerance

    print("KERNEL_OK")
</pallas_src>

<mosaic_0001>
module attributes {stable_mosaic.version = 11 : i64} {
  func.func @_linear_sigmoid_kernel(%arg0: memref<6x8xf32, #tpu.memory_space<vmem>>, %arg1: memref<6x1xf32, #tpu.memory_space<vmem>>, %arg2: memref<1xf32, #tpu.memory_space<smem>>, %arg3: memref<1x8xf32, #tpu.memory_space<vmem>>) attributes {dimension_semantics = [], scalar_prefetch = 0 : i64, scratch_operands = 0 : i64, tpu.core_type = #tpu.core_type<tc>} {
    %c0 = arith.constant 0 : index
    %c0_0 = arith.constant 0 : index
    %0 = vector.load %arg0[%c0, %c0_0] : memref<6x8xf32, #tpu.memory_space<vmem>>, vector<6x8xf32>
    %c0_1 = arith.constant 0 : index
    %c0_2 = arith.constant 0 : index
    %1 = vector.load %arg1[%c0_1, %c0_2] : memref<6x1xf32, #tpu.memory_space<vmem>>, vector<6x1xf32>
    %c0_3 = arith.constant 0 : index
    %2 = memref.load %arg2[%c0_3] : memref<1xf32, #tpu.memory_space<smem>>
    %3 = vector.broadcast %1 : vector<6x1xf32> to vector<6x8xf32>
    %4 = arith.mulf %0, %3 : vector<6x8xf32>
    %cst = arith.constant dense<0.000000e+00> : vector<8xf32>
    %5 = vector.multi_reduction <add>, %4, %cst [0] : vector<6x8xf32> to vector<8xf32>
    %6 = vector.shape_cast %5 : vector<8xf32> to vector<1x8xf32>
    %7 = vector.broadcast %2 : f32 to vector<1x8xf32>
    %8 = arith.addf %6, %7 : vector<1x8xf32>
    %9 = arith.negf %8 : vector<1x8xf32>
    %10 = math.exp %9 : vector<1x8xf32>
    %cst_4 = arith.constant 1.000000e+00 : f32
    %11 = vector.broadcast %cst_4 : f32 to vector<1x8xf32>
    %12 = arith.addf %11, %10 : vector<1x8xf32>
    %13 = arith.divf %11, %12 : vector<1x8xf32>
    %c0_5 = arith.constant 0 : index
    %c0_6 = arith.constant 0 : index
    %14 = vector.load %arg3[%c0_5, %c0_6] : memref<1x8xf32, #tpu.memory_space<vmem>>, vector<1x8xf32>
    tpu.vector_store %arg3[%c0_5, %c0_6], %13 {strides = array<i32>} : memref<1x8xf32, #tpu.memory_space<vmem>>, vector<1x8xf32>,
    return
  }
}

</mosaic_0001>

<bundles_post_ra>
// kernel: _forward.1
= control target key start
LH: loop header
LB: loop body
LE: loop exit
PB: predicated region body
PF: predicated region fallthrough
CT: control target
= control target key end

     0   :  { %s132_s0 = inlined_call_operand.vmem [shape: f32[6,8], index: 0, kind: input, shape index: {}]   ;;  %s133_s1 = inlined_call_operand.vmem [shape: f32[6,1], index: 1, kind: input, shape index: {}]   ;;  %s134_s2 = inlined_call_operand.<no memory space> [shape: f32[1], index: 2, kind: input, shape index: {}]   ;;  %s135_s3 = inlined_call_operand.hbm [shape: f32[1,8], index: 3, kind: output, shape index: {}]  }
   0x1   :  { %v17_v0 = vld [vmem:[%s133_s1] sm:$0x3f] }
   0x2   :  { %9 = vsyncpa [#allocation4], 0  ;;  %v89_v1 = vmov 0   ;;  %v16_v2 = vld [vmem:[%s132_s0] sm:$0x3f]  ;;  %vm25_vm0 = vcmask 62464   ;;  %v33_v11 = vstv %s134_s2 }
   0x3   :  { %60 = vset.pattern.permute.xlu0 %v89_v1  ;;  %s90_s0 = smov [#allocation3]   ;;  %vm41_vm1 = vcmask 57344  }
   0x4   :  { %21 = vperm.xlu0 %60, %v17_v0   ;;  %s49_s1 = sshll.u32 %s90_s0, 4  ;;  %s50_s1 = int_to_ptr.vmem [resolvable:$true] %s49_s1 }
   0x5   :  { %s65_s18 = scalar_lea.vmem %s50_s1, 16  ;;  %s69_s19 = scalar_lea.vmem %s50_s1, 32 }
   0x6   :  { %p66_p0 = scmp.ne.s32.totalorder %s50_s1, %s65_s18  ;;  %p70_p1 = scmp.lt.s32.totalorder %s50_s1, %s50_s1 }
   0x7   :  { %p71_p2 = scmp.lt.s32.totalorder %s69_s19, %s65_s18 }
   0x9   :  { %p72_p3 = por %p71_p2, %p70_p1 }
   0xb   :  { %p73_p4 = pnand %p72_p3, %p66_p0 }
  0x83   :  { %v22_v3 = vpop.permute.xlu0 %21 }
  0x84   :  { %v24_v4 = vmul.f32 %v22_v3, %v16_v2 }
  0x86   :  { %v26_v5 = vsel %vm25_vm0, %v24_v4, 0.0 }
  0x87   :  { %v27_v6 = vrot.slane %v26_v5, 4 }
  0x89   :  { %v28_v7 = vadd.f32 %v27_v6, %v26_v5 }
  0x8b   :  { %v29_v8 = vrot.slane %v28_v7, 2 }
  0x8d   :  { %v30_v9 = vadd.f32 %v29_v8, %v28_v7 }
  0x8f   :  { %v31_v10 = vrot.slane %v30_v9, 1 }
  0x91   :  { %v32_v12 = vadd.f32 %v31_v10, %v30_v9 }
  0x93   :  { %v34_v13 = vadd.f32 %v33_v11, %v32_v12 }
  0x95   :  { %v57_v14 = vmul.f32 -1.442695, %v34_v13 }
  0x97   :  { %61 = vpow2.f32 %v57_v14 }
  0xa1   :  { %v62_v15 = vpop.eup %61 }
  0xa2   :  { %v38_v16 = vadd.f32 1.0, %v62_v15 }
  0xa4   :  { %63 = vrcp.f32 %v38_v16 }
  0xae   :  { %v64_v17 = vpop.eup %63 }
  0xaf   :  { %42 = vst.msk [vmem:[#allocation3] sm:$0x1] %vm41_vm1, %v64_v17 }
  0xb0   :  { %76 = shalt.err (!%p73_p4)
}
  0xb1   :  { %s77_s21 = scalar_lea.hbm %s135_s3, 16 }
  0xb2   :  { %p78_p5 = scmp.ne.s32.totalorder %s135_s3, %s77_s21  ;;  %p81_p6 = scmp.lt.u32.totalorder %s77_s21, %s135_s3 }
  0xb4   :  { %p83_p7 = pnand %p81_p6, %p78_p5 }
  0xb6   :  { %86 = shalt.err (!%p83_p7)
}
  0xb7   :  { %52 = dma.vmem_to_hbm [thread:$0]  %s50_s1, 16, %s135_s3, [#allocation4]  }
  0xb8   :  { %87 = dma.done.wait [#allocation4], 16  }
  0xb9   :  { %88 = vsyncadd [#allocation4], 4294967280 }
  0xba   :  { %56 = vsyncpa [#allocation4], 1 }

</bundles_post_ra>
